<compile_context>
chip_gen: v5e
topology: v5e:2x2
jax: 0.10.0
libtpu: 0.0.40
codegen_flags: <defaults>
</compile_context>

<pallas_src>
import functools
import numpy as np

import jax
import jax.numpy as jnp
from jax.experimental import pallas as pl
from jax.experimental.pallas import tpu as pltpu

ACT_NONE, ACT_LRELU, ACT_SIGMOID, ACT_TANH = 0, 1, 2, 3
EPI_NONE, EPI_RES, EPI_SFF = 0, 1, 2


# ----------------------------------------------------------------------------
# Conv kernel: one (TM, K) @ (K, Coutp) bf16 dot per grid step, fused epilogue.
# ----------------------------------------------------------------------------
def _conv_kernel(act, epi, taps_ref, w_ref, b_ref, *refs):
    o_ref = refs[-1]
    y = jnp.dot(taps_ref[...], w_ref[...], preferred_element_type=jnp.float32)
    y = y + b_ref[...]
    if act == ACT_LRELU:
        y = jnp.where(y > 0, y, 0.2 * y)
    elif act == ACT_SIGMOID:
        y = jax.nn.sigmoid(y)
    elif act == ACT_TANH:
        y = jnp.tanh(y)
    if epi == EPI_RES:
        y = y + refs[0][...]
    elif epi == EPI_SFF:
        d = refs[0][...]
        r = refs[1][...]
        y = d + (r - d) * y
    o_ref[...] = y.astype(o_ref.dtype)


@functools.lru_cache(maxsize=None)
def _conv_call(n_tiles, TM, K, Coutp, Cout, act, epi, n_extra, out_dtype_name):
    out_dtype = jnp.dtype(out_dtype_name)
    in_specs = [
        pl.BlockSpec((TM, K), lambda m: (m, 0)),        # taps  (bf16)
        pl.BlockSpec((K, Coutp), lambda m: (0, 0)),     # weights (bf16)
        pl.BlockSpec((1, Coutp), lambda m: (0, 0)),     # bias   (f32)
    ]
    for _ in range(n_extra):                            # residual / sff inputs
        in_specs.append(pl.BlockSpec((TM, Cout), lambda m: (m, 0)))

    # double-buffered VMEM footprint estimate + headroom (safe on v7x 64 MiB)
    est = 2 * (TM * K * 2 + K * Coutp * 2 + Coutp * 4
               + TM * Coutp * 4 + n_extra * TM * Cout * 4)
    vmem_limit = int(min(max(2 * est, 32 * 1024 * 1024), 56 * 1024 * 1024))

    return jax.jit(pl.pallas_call(
        functools.partial(_conv_kernel, act, epi),
        out_shape=jax.ShapeDtypeStruct((n_tiles * TM, Coutp), out_dtype),
        grid_spec=pltpu.PrefetchScalarGridSpec(
            num_scalar_prefetch=0,
            grid=(n_tiles,),
            in_specs=in_specs,
            out_specs=pl.BlockSpec((TM, Coutp), lambda m: (m, 0))),
        compiler_params=pltpu.CompilerParams(
            dimension_semantics=("parallel",),
            vmem_limit_bytes=vmem_limit),
    ))


def _round_up(x, m):
    return ((x + m - 1) // m) * m


def _choose_tm(M):
    if M >= 1024:
        return 512                      # >=2 parallel tiles (v7x 2-TC friendly)
    return max(8, _round_up(M, 8))      # single tile


def conv2d(x, w, b, *, stride=1, dilation=1, padding=0, act=ACT_NONE,
           residual=None, sff_pair=None):
    """x:(N,H,W,Cin) f32, w:(KH,KW,Cin,Cout), b:(Cout,)|None.
    residual:  adds `residual` after the activation (fused epilogue).
    sff_pair:  (degraded, ref) -> output = d + (r-d)*conv_out (fused epilogue)."""
    N, H, W, Cin = x.shape
    KH, KW, _, Cout = w.shape
    Ho = (H + 2 * padding - dilation * (KH - 1) - 1) // stride + 1
    Wo = (W + 2 * padding - dilation * (KW - 1) - 1) // stride + 1
    M = N * Ho * Wo
    K = KH * KW * Cin

    # im2col folded into the contraction dim, built once in bf16.
    xp = jnp.pad(x, ((0, 0), (padding, padding), (padding, padding), (0, 0)))
    xp = xp.astype(jnp.bfloat16)
    cols = []
    for kh in range(KH):
        for kw in range(KW):
            h0 = kh * dilation
            w0 = kw * dilation
            sl = xp[:, h0:h0 + (Ho - 1) * stride + 1:stride,
                    w0:w0 + (Wo - 1) * stride + 1:stride, :]
            cols.append(sl.reshape(M, Cin))
    taps = cols[0] if len(cols) == 1 else jnp.concatenate(cols, axis=-1)  # (M,K)

    K16 = _round_up(K, 16)
    if K16 != K:
        taps = jnp.pad(taps, ((0, 0), (0, K16 - K)))

    wmat = w.reshape(K, Cout).astype(jnp.bfloat16)
    if K16 != K:
        wmat = jnp.pad(wmat, ((0, K16 - K), (0, 0)))

    # fused epilogue inputs
    if sff_pair is not None:
        epi = EPI_SFF
        extras = [e.reshape(M, Cout) for e in sff_pair]
    elif residual is not None:
        epi = EPI_RES
        extras = [residual.reshape(M, Cout)]
    else:
        epi = EPI_NONE
        extras = []

    # lane-dense output: pad Cout<128 to 128 (only when no fused extras).
    Coutp = Cout
    if epi == EPI_NONE and Cout < 128:
        Coutp = 128
    if Coutp != Cout:
        wmat = jnp.pad(wmat, ((0, 0), (0, Coutp - Cout)))
    bvec = (b if b is not None else jnp.zeros((Cout,), jnp.float32)).astype(jnp.float32)
    if Coutp != Cout:
        bvec = jnp.pad(bvec, (0, Coutp - Cout))
    bvec = bvec.reshape(1, Coutp)

    TM = _choose_tm(M)
    n_tiles = -(-M // TM)
    M_pad = n_tiles * TM
    if M_pad != M:
        taps = jnp.pad(taps, ((0, M_pad - M), (0, 0)))
        extras = [jnp.pad(e, ((0, M_pad - M), (0, 0))) for e in extras]

    out2d = _conv_call(n_tiles, TM, K16, Coutp, Cout, act, epi,
                       len(extras), 'float32')(taps, wmat, bvec, *extras)
    out2d = out2d[:M, :Cout]
    return out2d.reshape(N, Ho, Wo, Cout)


# ----------------------------------------------------------------------------
# AdaIN kernel (single-pass sum / sum-of-squares, rsqrt, unbiased var + eps)
# ----------------------------------------------------------------------------
def _adain_kernel(c_ref, s_ref, o_ref):
    c = c_ref[...].astype(jnp.float32)            # (1,H,W,C)
    s = s_ref[...].astype(jnp.float32)
    hw = float(c.shape[1] * c.shape[2])
    eps = 1e-5
    c_sum = jnp.sum(c, axis=(1, 2), keepdims=True)
    c_sq = jnp.sum(c * c, axis=(1, 2), keepdims=True)
    s_sum = jnp.sum(s, axis=(1, 2), keepdims=True)
    s_sq = jnp.sum(s * s, axis=(1, 2), keepdims=True)
    c_mean = c_sum / hw
    s_mean = s_sum / hw
    # torch .var(dim=2) default is unbiased -> divide by (HW - 1)
    c_var = (c_sq - hw * c_mean * c_mean) / (hw - 1.0) + eps
    s_var = (s_sq - hw * s_mean * s_mean) / (hw - 1.0) + eps
    scale = jnp.sqrt(s_var) * jax.lax.rsqrt(c_var)
    o_ref[...] = ((c - c_mean) * scale + s_mean).astype(o_ref.dtype)


@functools.lru_cache(maxsize=None)
def _adain_call(N, H, W, C, dtype_name):
    dtype = jnp.dtype(dtype_name)
    return jax.jit(pl.pallas_call(
        _adain_kernel,
        out_shape=jax.ShapeDtypeStruct((N, H, W, C), dtype),
        grid=(N,),
        in_specs=[pl.BlockSpec((1, H, W, C), lambda n: (n, 0, 0, 0)),
                  pl.BlockSpec((1, H, W, C), lambda n: (n, 0, 0, 0))],
        out_specs=pl.BlockSpec((1, H, W, C), lambda n: (n, 0, 0, 0)),
        compiler_params=pltpu.CompilerParams(
            dimension_semantics=("parallel",)),
    ))


def adaptive_instance_normalization_4d(content, style):
    N, H, W, C = content.shape
    return _adain_call(N, H, W, C, str(content.dtype))(content, style)


# ----------------------------------------------------------------------------
# Bilinear 2x upsample (align_corners=True) as one kron-matrix matmul.
# ----------------------------------------------------------------------------
def _upsample_kernel(k_ref, x_ref, o_ref):
    o_ref[0] = jnp.dot(k_ref[...], x_ref[0],
                       preferred_element_type=jnp.float32).astype(o_ref.dtype)


@functools.lru_cache(maxsize=None)
def _upsample_call(N, OHW, HW, C, dtype_name):
    dtype = jnp.dtype(dtype_name)
    return jax.jit(pl.pallas_call(
        _upsample_kernel,
        out_shape=jax.ShapeDtypeStruct((N, OHW, C), dtype),
        grid=(N,),
        in_specs=[pl.BlockSpec((OHW, HW), lambda n: (0, 0)),
                  pl.BlockSpec((1, HW, C), lambda n: (n, 0, 0))],
        out_specs=pl.BlockSpec((1, OHW, C), lambda n: (n, 0, 0)),
        compiler_params=pltpu.CompilerParams(
            dimension_semantics=("parallel",),
            vmem_limit_bytes=32 * 1024 * 1024),
    ))


def _interp_matrix_np(out_size, in_size):
    # bilinear, align_corners=True
    src = np.arange(out_size, dtype=np.float64) * (in_size - 1) / max(out_size - 1, 1)
    lo = np.clip(np.floor(src).astype(np.int64), 0, max(in_size - 2, 0))
    frac = src - lo
    A = np.zeros((out_size, in_size), np.float64)
    A[np.arange(out_size), lo] = 1.0 - frac
    A[np.arange(out_size), np.minimum(lo + 1, in_size - 1)] += frac
    return A


@functools.lru_cache(maxsize=None)
def _upsample_matrix(H, W):
    Ah = _interp_matrix_np(2 * H, H)
    Aw = _interp_matrix_np(2 * W, W)
    # out[oh*2W+ow, h*W+w] = Ah[oh,h]*Aw[ow,w]
    return jnp.asarray(np.kron(Ah, Aw).astype(np.float32), jnp.bfloat16)


def upsample2x_bilinear(x):
    """nn.Upsample(scale_factor=2, mode='bilinear', align_corners=True)."""
    N, H, W, C = x.shape
    Kmat = _upsample_matrix(H, W)                         # (4HW, HW) bf16
    xb = x.reshape(N, H * W, C).astype(jnp.bfloat16)
    out = _upsample_call(N, 4 * H * W, H * W, C, 'float32')(Kmat, xb)
    return out.reshape(N, 2 * H, 2 * W, C)


# ----------------------------------------------------------------------------
# Deterministic parameter initialization (spectral_norm folded into init).
# ----------------------------------------------------------------------------
class ParamGen:
    def __init__(self, key):
        self.key = key

    def conv(self, kh, kw, cin, cout, bias=True):
        self.key, k1, k2 = jax.random.split(self.key, 3)
        fan = kh * kw * cin
        w = jax.random.normal(k1, (kh, kw, cin, cout), jnp.float32) * (0.5 / np.sqrt(fan))
        b = (jax.random.normal(k2, (cout,), jnp.float32) * 0.01) if bias else None
        return (w, b)


# ----------------------------------------------------------------------------
# Module forward functions (mirroring the PyTorch graph)
# ----------------------------------------------------------------------------
def init_resnet_block(pg, c):
    return [pg.conv(3, 3, c, c), pg.conv(3, 3, c, c)]


def resnet_block_fwd(p, x, dil):
    h = conv2d(x, *p[0], padding=dil[0], dilation=dil[0], act=ACT_LRELU)
    # out = stem(x) + x  (residual fused into second conv's epilogue)
    return conv2d(h, *p[1], padding=dil[1], dilation=dil[1], act=ACT_NONE,
                  residual=x)


def init_feat_ex(pg, ngf=64):
    return dict(
        conv1=pg.conv(3, 3, 3, ngf),
        s11=init_resnet_block(pg, ngf), s12=init_resnet_block(pg, ngf),
        conv2=pg.conv(3, 3, ngf, ngf * 2),
        s21=init_resnet_block(pg, ngf * 2), s22=init_resnet_block(pg, ngf * 2),
        conv3=pg.conv(3, 3, ngf * 2, ngf * 4),
        s31=init_resnet_block(pg, ngf * 4), s32=init_resnet_block(pg, ngf * 4),
        conv4=pg.conv(3, 3, ngf * 4, ngf * 2))


def feat_ex_fwd(p, img):
    f1 = conv2d(img, *p['conv1'], padding=1, act=ACT_LRELU)
    f1 = resnet_block_fwd(p['s12'], resnet_block_fwd(p['s11'], f1, [7, 5]), [7, 5])
    f2 = conv2d(f1, *p['conv2'], stride=2, padding=1, act=ACT_LRELU)
    f2 = resnet_block_fwd(p['s22'], resnet_block_fwd(p['s21'], f2, [5, 3]), [5, 3])
    f3 = conv2d(f2, *p['conv3'], stride=2, padding=1, act=ACT_LRELU)
    f3 = resnet_block_fwd(p['s32'], resnet_block_fwd(p['s31'], f3, [3, 1]), [3, 1])
    return conv2d(f3, *p['conv4'], padding=1, act=ACT_LRELU)


def init_mask_cm(pg, out_c=128):
    return [pg.conv(9, 9, 1, 16, bias=False), pg.conv(7, 7, 16, 32, bias=False),
            pg.conv(5, 5, 32, 64, bias=False), pg.conv(3, 3, 64, out_c, bias=False),
            pg.conv(3, 3, out_c, out_c, bias=False)]


def mask_cm_fwd(p, x):
    x = conv2d(x, *p[0], stride=2, padding=4, act=ACT_LRELU)
    x = conv2d(x, *p[1], stride=1, padding=3, act=ACT_LRELU)
    x = conv2d(x, *p[2], stride=2, padding=2, act=ACT_LRELU)
    x = conv2d(x, *p[3], stride=1, padding=1, act=ACT_LRELU)
    x = conv2d(x, *p[4], stride=1, padding=1, act=ACT_SIGMOID)
    return x


def init_upres(pg, d):
    return [pg.conv(3, 3, d, d), pg.conv(3, 3, d, d)]


def upres_fwd(p, x):
    h = conv2d(x, *p[0], padding=1, act=ACT_LRELU)
    return conv2d(h, *p[1], padding=1, act=ACT_LRELU, residual=x)


def init_comp_cm(pg, c=128):
    return dict(c0=pg.conv(1, 1, c, c), r0=init_upres(pg, c),
                c1=pg.conv(1, 1, c, c), r1=init_upres(pg, c),
                c2=pg.conv(1, 1, c, c))


def comp_cm_fwd(p, x):
    x = conv2d(x, *p['c0'], act=ACT_LRELU)
    x = upres_fwd(p['r0'], x)
    x = conv2d(x, *p['c1'], act=ACT_LRELU)
    x = upres_fwd(p['r1'], x)
    x = conv2d(x, *p['c2'], act=ACT_LRELU)
    return x


def init_sff(pg, c=128):
    return dict(
        mask_m0=pg.conv(3, 3, c // 2 * 3, c, bias=False),
        mask_m1=pg.conv(3, 3, c, c, bias=False),
        mask_cat=pg.conv(1, 1, c, c // 2),
        deg_m0=pg.conv(3, 3, c, c), deg_m1=pg.conv(3, 3, c, c),
        deg_cat=pg.conv(1, 1, c, c // 2),
        ref_m0=pg.conv(3, 3, c, c), ref_m1=pg.conv(3, 3, c, c),
        ref_cat=pg.conv(1, 1, c, c // 2))


def sff_fwd(p, X):
    deg_in, ref_in, mask_c = X
    degraded = conv2d(conv2d(deg_in, *p['deg_m0'], padding=1, act=ACT_LRELU),
                      *p['deg_m1'], padding=1, act=ACT_NONE)
    reff = conv2d(conv2d(ref_in, *p['ref_m0'], padding=1, act=ACT_LRELU),
                  *p['ref_m1'], padding=1, act=ACT_NONE)
    down_mask = conv2d(mask_c, *p['mask_cat'], act=ACT_NONE)
    down_deg = conv2d(degraded, *p['deg_cat'], act=ACT_NONE)
    down_ref = conv2d(reff, *p['ref_cat'], act=ACT_NONE)
    cat = jnp.concatenate([down_mask, down_deg, down_ref], axis=-1)
    h = conv2d(cat, *p['mask_m0'], padding=1, act=ACT_LRELU)
    # D + (R - D) * MaskF fused into the last mask conv's epilogue
    return conv2d(h, *p['mask_m1'], padding=1, act=ACT_NONE,
                  sff_pair=(degraded, reff))


def init_asff_block(pg, c=128):
    return dict(sff0=init_sff(pg, c),
                conv0=[pg.conv(5, 5, c, c), pg.conv(3, 3, c, c)],
                sff1=init_sff(pg, c),
                conv1=[pg.conv(5, 5, c, c), pg.conv(3, 3, c, c)])


def asff_block_fwd(p, X):
    fea1_1 = sff_fwd(p['sff0'], X)
    fea1_2 = conv2d(conv2d(fea1_1, *p['conv0'][0], padding=2, act=ACT_LRELU),
                    *p['conv0'][1], padding=1, act=ACT_LRELU)
    fea2_1 = sff_fwd(p['sff1'], (fea1_2, X[1], X[2]))
    out = conv2d(conv2d(fea2_1, *p['conv1'][0], padding=2, act=ACT_LRELU),
                 *p['conv1'][1], padding=1, act=ACT_LRELU, residual=X[0])
    return (out, X[1], X[2])


def init_msdilate(pg, c=128):
    return dict(c1=pg.conv(3, 3, c, c // 2), c2=pg.conv(3, 3, c, c // 2),
                c3=pg.conv(3, 3, c, c // 2), c4=pg.conv(3, 3, c, c // 2),
                i0=pg.conv(3, 3, c * 2, c), i1=pg.conv(3, 3, c, c))


def msdilate_fwd(p, x, dil=(4, 3, 2, 1)):
    outs = [conv2d(x, *p[k], padding=d, dilation=d, act=ACT_LRELU)
            for k, d in zip(['c1', 'c2', 'c3', 'c4'], dil)]
    cat = jnp.concatenate(outs, axis=-1)
    h = conv2d(cat, *p['i0'], padding=1, act=ACT_LRELU)
    return conv2d(h, *p['i1'], padding=1, act=ACT_NONE, residual=x)


def init_updilres(pg, d):
    return [pg.conv(3, 3, d, d), pg.conv(3, 3, d, d),
            pg.conv(3, 3, d, d), pg.conv(3, 3, d, d)]


def updilres_fwd(p, x, dil):
    h = conv2d(x, *p[0], padding=dil[0], dilation=dil[0], act=ACT_LRELU)
    out = conv2d(h, *p[1], padding=dil[0], dilation=dil[0], act=ACT_LRELU,
                 residual=x)
    h2 = conv2d(out, *p[2], padding=dil[1], dilation=dil[1], act=ACT_LRELU)
    return conv2d(h2, *p[3], padding=dil[1], dilation=dil[1], act=ACT_LRELU,
                  residual=out)


def init_upmodel(pg):
    return dict(c0=pg.conv(3, 3, 128, 128), r0=init_updilres(pg, 128),
                c1=pg.conv(3, 3, 128, 64), r1=init_updilres(pg, 64),
                r2=init_updilres(pg, 64), c2=pg.conv(3, 3, 64, 3))


def upmodel_fwd(p, x):
    x = upsample2x_bilinear(x)
    x = conv2d(x, *p['c0'], padding=1, act=ACT_LRELU)
    x = updilres_fwd(p['r0'], x, [1, 2])
    x = conv2d(x, *p['c1'], padding=1, act=ACT_LRELU)
    x = updilres_fwd(p['r1'], x, [1, 2])
    x = upsample2x_bilinear(x)
    x = updilres_fwd(p['r2'], x, [1, 1])
    x = conv2d(x, *p['c2'], padding=1, act=ACT_TANH)
    return x


def init_asffnet(key):
    pg = ParamGen(key)
    return dict(
        sff_blocks=[init_asff_block(pg) for _ in range(4)],
        fusion=init_sff(pg),
        msdilate=init_msdilate(pg),
        upmodel=init_upmodel(pg),
        lq_model=init_feat_ex(pg),
        ref_model=init_feat_ex(pg),
        mask_cm=init_mask_cm(pg),
        comp_cm=init_comp_cm(pg))


def asffnet_fwd(p, LQ, Ref, Mask, lq_landmark, ref_landmark):
    lq_fea = feat_ex_fwd(p['lq_model'], LQ)
    ref_fea = feat_ex_fwd(p['ref_model'], Ref)

    downscale = LQ.shape[1] / lq_fea.shape[1]              # H axis (NHWC)
    lq_landmark_d = jnp.transpose(lq_landmark / downscale, (0, 2, 1))
    ref_landmark_d = jnp.transpose(ref_landmark / downscale, (0, 2, 1))
    del lq_landmark_d, ref_landmark_d  # only consumed by the MLS warp below

    adain_ref = adaptive_instance_normalization_4d(ref_fea, lq_fea)
    # TODO(synk): MLS.MLS() (moving-least-squares landmark warp) is an external
    # module whose source is not provided; the warp is applied as identity here.
    mls_ref_fea = adain_ref

    mask_c = mask_cm_fwd(p['mask_cm'], Mask)
    comp_c = comp_cm_fwd(p['comp_cm'], mls_ref_fea)

    X = (lq_fea, comp_c, mask_c)
    for blk in p['sff_blocks']:
        X = asff_block_fwd(blk, X)
    fea = sff_fwd(p['fusion'], X)

    ms_fea = msdilate_fwd(p['msdilate'], fea)
    asff_fea = ms_fea + lq_fea
    out = upmodel_fwd(p['upmodel'], asff_fea)
    return out, dict(lq_fea=lq_fea, ref_fea=ref_fea, bin_fea=mask_c,
                     warped_ref_fea=mls_ref_fea, asff_fea=asff_fea)


# ----------------------------------------------------------------------------
if __name__ == "__main__":
    key = jax.random.PRNGKey(0)
    pkey, dkey = jax.random.split(key)
    params = init_asffnet(pkey)

    k1, k2, k3, k4, k5 = jax.random.split(dkey, 5)
    N, H, W = 1, 32, 32
    # NHWC inputs (equivalent to torch NCHW [1,3,32,32] / [1,1,32,32])
    LQ = jax.random.normal(k1, (N, H, W, 3), jnp.float32)
    Ref = jax.random.normal(k2, (N, H, W, 3), jnp.float32)
    Mask = jax.random.uniform(k3, (N, H, W, 1), jnp.float32)
    lq_landmark = jax.random.uniform(k4, (N, 5, 2), jnp.float32) * H
    ref_landmark = jax.random.uniform(k5, (N, 5, 2), jnp.float32) * H

    out, aux = asffnet_fwd(params, LQ, Ref, Mask, lq_landmark, ref_landmark)
    jax.block_until_ready(out)
    for v in aux.values():
        jax.block_until_ready(v)

    assert out.shape == (N, H, W, 3)
    assert aux['lq_fea'].shape == (N, H // 4, W // 4, 128)
    assert aux['bin_fea'].shape == (N, H // 4, W // 4, 128)
    assert bool(jnp.all(jnp.isfinite(out)))
    print("KERNEL_OK")
</pallas_src>

<mosaic_0001>
module attributes {stable_mosaic.version = 11 : i64} {
  func.func @_conv_kernel(%arg0: i32, %arg1: memref<512x32xbf16, #tpu.memory_space<vmem>>, %arg2: memref<32x128xbf16, #tpu.memory_space<vmem>>, %arg3: memref<1x128xf32, #tpu.memory_space<vmem>>, %arg4: memref<512x128xf32, #tpu.memory_space<vmem>>) attributes {dimension_semantics = [#tpu.dimension_semantics<parallel>], iteration_bounds = array<i64: 2>, scalar_prefetch = 0 : i64, scratch_operands = 0 : i64, tpu.core_type = #tpu.core_type<tc>, window_params = [{transform_indices = @transform_0, window_bounds = array<i64: 512, 32>}, {pipeline_mode = #tpu.pipeline_mode<synchronous>, transform_indices = @transform_1, window_bounds = array<i64: 32, 128>}, {pipeline_mode = #tpu.pipeline_mode<synchronous>, transform_indices = @transform_2, window_bounds = array<i64: 1, 128>}, {transform_indices = @transform_3, window_bounds = array<i64: 512, 128>}]} {
    %c0 = arith.constant 0 : index
    %c0_0 = arith.constant 0 : index
    %0 = vector.load %arg1[%c0, %c0_0] : memref<512x32xbf16, #tpu.memory_space<vmem>>, vector<512x32xbf16>
    %c0_1 = arith.constant 0 : index
    %c0_2 = arith.constant 0 : index
    %1 = vector.load %arg2[%c0_1, %c0_2] : memref<32x128xbf16, #tpu.memory_space<vmem>>, vector<32x128xbf16>
    %cst = arith.constant dense<0.000000e+00> : vector<512x128xf32>
    %2 = tpu.matmul %0, %1, %cst {dimension_numbers = #tpu.dot_dimension_numbers<[1], [0], [0], [1], [0, 0, 1, 1], [], []>} : vector<512x32xbf16>, vector<32x128xbf16>, vector<512x128xf32> -> vector<512x128xf32>
    %c0_3 = arith.constant 0 : index
    %c0_4 = arith.constant 0 : index
    %3 = vector.load %arg3[%c0_3, %c0_4] : memref<1x128xf32, #tpu.memory_space<vmem>>, vector<1x128xf32>
    %4 = vector.broadcast %3 : vector<1x128xf32> to vector<512x128xf32>
    %5 = arith.addf %2, %4 : vector<512x128xf32>
    %cst_5 = arith.constant 0.000000e+00 : f32
    %6 = vector.broadcast %cst_5 : f32 to vector<512x128xf32>
    %7 = arith.cmpf ogt, %5, %6 : vector<512x128xf32>
    %cst_6 = arith.constant 2.000000e-01 : f32
    %8 = vector.broadcast %cst_6 : f32 to vector<512x128xf32>
    %9 = arith.mulf %8, %5 : vector<512x128xf32>
    %10 = arith.select %7, %5, %9 : vector<512x128xi1>, vector<512x128xf32>
    %c0_7 = arith.constant 0 : index
    %c0_8 = arith.constant 0 : index
    %11 = vector.load %arg4[%c0_7, %c0_8] : memref<512x128xf32, #tpu.memory_space<vmem>>, vector<512x128xf32>
    tpu.vector_store %arg4[%c0_7, %c0_8], %10 {strides = array<i32>} : memref<512x128xf32, #tpu.memory_space<vmem>>, vector<512x128xf32>,
    return
  }
  func.func @transform_0(%arg0: i32) -> (i32, i32) {
    %c0_i32 = arith.constant 0 : i32
    %c0_i32_0 = arith.constant 0 : i32
    return %arg0, %c0_i32 : i32, i32
  }
  func.func @transform_1(%arg0: i32) -> (i32, i32) {
    %c0_i32 = arith.constant 0 : i32
    %c0_i32_0 = arith.constant 0 : i32
    %c0_i32_1 = arith.constant 0 : i32
    return %c0_i32, %c0_i32_0 : i32, i32
  }
  func.func @transform_2(%arg0: i32) -> (i32, i32) {
    %c0_i32 = arith.constant 0 : i32
    %c0_i32_0 = arith.constant 0 : i32
    %c0_i32_1 = arith.constant 0 : i32
    return %c0_i32, %c0_i32_0 : i32, i32
  }
  func.func @transform_3(%arg0: i32) -> (i32, i32) {
    %c0_i32 = arith.constant 0 : i32
    %c0_i32_0 = arith.constant 0 : i32
    return %arg0, %c0_i32 : i32, i32
  }
}

</mosaic_0001>

<bundles_post_ra>
// kernel: tpu_custom_call.1
= control target key start
LH: loop header
LB: loop body
LE: loop exit
PB: predicated region body
PF: predicated region fallthrough
CT: control target
= control target key end

     0   :  { %8 = vsyncpa [#allocation3], 0  ;;  %s1662_s0 = inlined_call_operand.vmem [shape: bf16[1024,32], index: 0, kind: input, shape index: {}]   ;;  %s1663_s1 = inlined_call_operand.vmem [shape: bf16[32,128], index: 1, kind: input, shape index: {}]   ;;  %s1664_s2 = inlined_call_operand.vmem [shape: f32[1,128], index: 2, kind: input, shape index: {}]   ;;  %s1665_s3 = inlined_call_operand.hbm [shape: f32[1024,128], index: 3, kind: output, shape index: {}]  }
   0x1   :  { %10 = vsyncpa [#allocation3 + $0x1], 0  ;;  %s1366_s12 = smov 0   ;;  %s1368_s13 = smov 0  }
   0x2   :  { %s1370_s14 = smov 0   ;;  %s1372_s15 = smov 0  }
   0x3 LB: > { %s1387_s16 = sadd.s32 4294967295, %s1342_s15   ;;  %s1017_s17 = sadd.s32 4294967294, %s1342_s15   ;;  %s1342_s15 = sphi %s1372_s15, %s1671_s15   ;;  %s1338_s14 = sphi %s1370_s14, %s1670_s14   ;;  %s1334_s13 = sphi %s1368_s13, %s1669_s13   ;;  %s1330_s12 = sphi %s1366_s12, %s1668_s12  }
   0x4   : > { %s1391_s18 = sadd.s32 1, %s1342_s15   ;;  %s91_s19 = sadd.s32 1, %s1338_s14 }
   0x5   : > { %s88_s20 = ssub.s32 %s1342_s15, %s1391_s18  ;;  %p101_p0 = scmp.ne.s32.totalorder %s1338_s14, %s1334_s13 }
   0x6   : > { %p89_p1 = scmp.eq.s32.totalorder %s88_s20, 0  ;;  %p102_p2 = scmp.eq.s32.totalorder %s1387_s16, 1 }
   0x7   : > { %p107_p3 = scmp.ne.s32.totalorder %s1334_s13, %s1330_s12  ;;  %p108_p4 = scmp.eq.s32.totalorder %s1017_s17, 1 }
   0x8   : > { %s1402_s21 = scalar_select %p89_p1, %s1338_s14, %s91_s19  }
   0x9   : > { %p1404_p5 = por %p102_p2, %p101_p0  ;;  %p1408_p6 = por %p108_p4, %p107_p3 }
   0xa   : > { %p1020_p7 = scmp.ge.s32.totalorder %s1342_s15, 1  ;;  %p141_p8 = scmp.lt.s32.totalorder %s1342_s15, 3 }
   0xc   : > { %p142_p9 = pnand %p1020_p7, %p141_p8 }
   0xd   : > { %s1022_s26 = sshll.u32 (!%p142_p9), %s1387_s16, 6  ;;  %s162_s6 = sand.u32 (!%p142_p9), 1, %s1334_s13  }
   0xe   : > { %145 = sbr.rel (%p142_p9) target bundleno = 290 (0x122), region = 32  ;;  %p166_p10 = scmp.lt.s32.totalorder (!%p142_p9), %s1022_s26, 127 }
   0xf   : > { %s1021_s9 = sshll.u32 (!%p142_p9), %s162_s6, 9  ;;  %s1231_s11 = sshll.u32 (!%p142_p9), %s1387_s16, 9 }
  0x10   : > { %s1500_s10 = scalar_lea.vmem (!%p142_p9), [#allocation2], %s1021_s9  ;;  %s951_s16 = scalar_lea.hbm (!%p142_p9), %s1665_s3, %s1231_s11 }
  0x11   : > { %s952_s20 = sshll.u32 (!%p142_p9), %s1500_s10, 4  ;;  %s954_s24 = sshll.u32 (!%p142_p9), %s951_s16, 4  ;;  %s953_s20 = int_to_ptr.vmem [resolvable:$true] %s952_s20  ;;  %s955_s24 = int_to_ptr.hbm [resolvable:$true] %s954_s24 }
  0x12   : > { %s940_s25 = scalar_lea.sflag (!%p142_p9), [#allocation3], %s162_s6  ;;  %s1300_s30 = scalar_lea.hbm (!%p142_p9), %s1665_s3, 1024 }
  0x13   : > { %v1230_v0 = vld [vmem:[%s1663_s1 + $0x8] sm:$0xff]  ;;  %v1229_v1 = vld [vmem:[%s1663_s1] sm:$0xff]  ;;  %s1673_s26 = smov (!%p166_p10, %s1022_s26), 127  ;;  %vm417_vm0 = vcmask 261120  }
  0x14   : > { %520 = vmatpush.bf16.msra.mxu0 %v1230_v0  ;;  %1232 = vmatpush.bf16.msra.mxu1 %v1230_v0  ;;  %s1023_s29 = sshll.u32 %s1673_s26, 2  ;;  %v1494_v34 = vld [vmem:[%s1664_s2] ss:$0 sm:$0xff]  ;;  %s1294_s26 = sshra.s32 %s955_s24, 4  ;;  %s1295_s26 = int_to_ptr.hbm [resolvable:$true] %s1294_s26 }
  0x15   : > { %1233 = vmatpush.bf16.msra.mxu2 %v1230_v0  ;;  %1234 = vmatpush.bf16.msra.mxu3 %v1230_v0  ;;  %s1424_s5 = scalar_lea.vmem %s1662_s0, %s1023_s29  ;;  %s1296_s27 = scalar_lea.hbm %s1295_s26, 512 }
  0x16   : > { %v1197_v2 = vld [vmem:[%s1424_s5] sm:$0xff]  ;;  %v1198_v6 = vld [vmem:[%s1424_s5 + $0x8] sm:$0xff]  ;;  %v1199_v10 = vld [vmem:[%s1424_s5 + $0x10] sm:$0xff]  ;;  %p1297_p11 = scmp.ne.s32.totalorder %s1295_s26, %s1296_s27  ;;  %p1301_p0 = scmp.lt.s32.totalorder %s1295_s26, %s1665_s3 }
  0x17   : > { %v1205_v3 = vld [vmem:[%s1424_s5 + $0x40] sm:$0xff]  ;;  %v1206_v7 = vld [vmem:[%s1424_s5 + $0x48] sm:$0xff]  ;;  %v1207_v11 = vld [vmem:[%s1424_s5 + $0x50] sm:$0xff]  ;;  %p1302_p1 = scmp.lt.s32.totalorder %s1300_s30, %s1296_s27 }
  0x18   : > { %521 = vmatpush.bf16.msra.mxu0 %v1229_v1  ;;  %1235 = vmatpush.bf16.msra.mxu1 %v1229_v1  ;;  %v1213_v4 = vld [vmem:[%s1424_s5 + $0x80] sm:$0xff]  ;;  %v1214_v8 = vld [vmem:[%s1424_s5 + $0x88] sm:$0xff]  ;;  %v1215_v12 = vld [vmem:[%s1424_s5 + $0x90] sm:$0xff]  ;;  %p1298_p12 = pnand %p1297_p11, %p1404_p5 }
  0x19   : > { %1236 = vmatpush.bf16.msra.mxu2 %v1229_v1  ;;  %1237 = vmatpush.bf16.msra.mxu3 %v1229_v1  ;;  %v1221_v5 = vld [vmem:[%s1424_s5 + $0xc0] sm:$0xff]  ;;  %v1222_v9 = vld [vmem:[%s1424_s5 + $0xc8] sm:$0xff]  ;;  %v1223_v13 = vld [vmem:[%s1424_s5 + $0xd0] sm:$0xff]  ;;  %p1303_p2 = por %p1302_p1, %p1301_p0 }
  0x1a   : > { %v1200_v14 = vld [vmem:[%s1424_s5 + $0x18] sm:$0xff]  ;;  %v1201_v18 = vld [vmem:[%s1424_s5 + $0x20] sm:$0xff]  ;;  %v1202_v22 = vld [vmem:[%s1424_s5 + $0x28] sm:$0xff]  ;;  %p1299_p13 = pneg %p1298_p12 }
  0x1b   : > { %1160 = vmatmul.msk.bf16.vlgmr.msra.gmra.mxu0 %vm417_vm0, %v1197_v2  ;;  %1168 = vmatmul.msk.bf16.vlgmr.msra.gmra.mxu1 %vm417_vm0, %v1205_v3  ;;  %v1208_v15 = vld [vmem:[%s1424_s5 + $0x58] sm:$0xff]  ;;  %v1209_v19 = vld [vmem:[%s1424_s5 + $0x60] sm:$0xff]  ;;  %v1210_v23 = vld [vmem:[%s1424_s5 + $0x68] sm:$0xff] }
  0x1c   : > { %1176 = vmatmul.msk.bf16.vlgmr.msra.gmra.mxu2 %vm417_vm0, %v1213_v4  ;;  %1184 = vmatmul.msk.bf16.vlgmr.msra.gmra.mxu3 %vm417_vm0, %v1221_v5  ;;  %v1216_v16 = vld [vmem:[%s1424_s5 + $0x98] sm:$0xff]  ;;  %v1217_v20 = vld [vmem:[%s1424_s5 + $0xa0] sm:$0xff]  ;;  %v1218_v24 = vld [vmem:[%s1424_s5 + $0xa8] sm:$0xff]  ;;  %p1304_p3 = pnand %p1303_p2, %p1299_p13 }
  0x1d   : > { %v1224_v17 = vld [vmem:[%s1424_s5 + $0xd8] sm:$0xff]  ;;  %v1225_v21 = vld [vmem:[%s1424_s5 + $0xe0] sm:$0xff]  ;;  %v1226_v25 = vld [vmem:[%s1424_s5 + $0xe8] sm:$0xff] }
  0x1e   : > { %v1203_v26 = vld [vmem:[%s1424_s5 + $0x30] sm:$0xff]  ;;  %v1204_v30 = vld [vmem:[%s1424_s5 + $0x38] sm:$0xff] }
  0x1f   : > { %v1211_v27 = vld [vmem:[%s1424_s5 + $0x70] sm:$0xff]  ;;  %v1212_v31 = vld [vmem:[%s1424_s5 + $0x78] sm:$0xff] }
  0x20   : > { %v1219_v28 = vld [vmem:[%s1424_s5 + $0xb0] sm:$0xff]  ;;  %v1220_v32 = vld [vmem:[%s1424_s5 + $0xb8] sm:$0xff] }
  0x21   : > { %v1227_v29 = vld [vmem:[%s1424_s5 + $0xf0] sm:$0xff]  ;;  %v1228_v33 = vld [vmem:[%s1424_s5 + $0xf8] sm:$0xff] }
  0x2b   : > { %1161 = vmatmul.msk.bf16.gmra.mxu0 %vm417_vm0, %v1198_v6  ;;  %1169 = vmatmul.msk.bf16.gmra.mxu1 %vm417_vm0, %v1206_v7 }
  0x2c   : > { %1177 = vmatmul.msk.bf16.gmra.mxu2 %vm417_vm0, %v1214_v8  ;;  %1185 = vmatmul.msk.bf16.gmra.mxu3 %vm417_vm0, %v1222_v9 }
  0x3b   : > { %1162 = vmatmul.msk.bf16.gmra.mxu0 %vm417_vm0, %v1199_v10  ;;  %1170 = vmatmul.msk.bf16.gmra.mxu1 %vm417_vm0, %v1207_v11 }
  0x3c   : > { %1178 = vmatmul.msk.bf16.gmra.mxu2 %vm417_vm0, %v1215_v12  ;;  %1186 = vmatmul.msk.bf16.gmra.mxu3 %vm417_vm0, %v1223_v13 }
  0x4b   : > { %1163 = vmatmul.msk.bf16.gmra.mxu0 %vm417_vm0, %v1200_v14  ;;  %1171 = vmatmul.msk.bf16.gmra.mxu1 %vm417_vm0, %v1208_v15 }
  0x4c   : > { %1179 = vmatmul.msk.bf16.gmra.mxu2 %vm417_vm0, %v1216_v16  ;;  %1187 = vmatmul.msk.bf16.gmra.mxu3 %vm417_vm0, %v1224_v17 }
  0x5b   : > { %1164 = vmatmul.msk.bf16.gmra.mxu0 %vm417_vm0, %v1201_v18  ;;  %1172 = vmatmul.msk.bf16.gmra.mxu1 %vm417_vm0, %v1209_v19 }
  0x5c   : > { %1180 = vmatmul.msk.bf16.gmra.mxu2 %vm417_vm0, %v1217_v20  ;;  %1188 = vmatmul.msk.bf16.gmra.mxu3 %vm417_vm0, %v1225_v21 }
  0x6b   : > { %1165 = vmatmul.msk.bf16.gmra.mxu0 %vm417_vm0, %v1202_v22  ;;  %1173 = vmatmul.msk.bf16.gmra.mxu1 %vm417_vm0, %v1210_v23 }
  0x6c   : > { %1181 = vmatmul.msk.bf16.gmra.mxu2 %vm417_vm0, %v1218_v24  ;;  %1189 = vmatmul.msk.bf16.gmra.mxu3 %vm417_vm0, %v1226_v25 }
  0x7b   : > { %1166 = vmatmul.msk.bf16.gmra.mxu0 %vm417_vm0, %v1203_v26  ;;  %1174 = vmatmul.msk.bf16.gmra.mxu1 %vm417_vm0, %v1211_v27 }
  0x7c   : > { %1182 = vmatmul.msk.bf16.gmra.mxu2 %vm417_vm0, %v1219_v28  ;;  %1190 = vmatmul.msk.bf16.gmra.mxu3 %vm417_vm0, %v1227_v29 }
  0x8b   : > { %1167 = vmatmul.msk.bf16.gmra.mxu0 %vm417_vm0, %v1204_v30  ;;  %1175 = vmatmul.msk.bf16.gmra.mxu1 %vm417_vm0, %v1212_v31 }
  0x8c   : > { %1183 = vmatmul.msk.bf16.gmra.mxu2 %vm417_vm0, %v1220_v32  ;;  %1191 = vmatmul.msk.bf16.gmra.mxu3 %vm417_vm0, %v1228_v33 }
  0x98   : > { %v523_v35 = vpop.f32.mrf.mxu0  ;;  %v563_v36 = vpop.f32.mrf.mxu1 }
  0x99   : > { %v524_v37 = vadd.f32 %v1494_v34, %v523_v35  ;;  %v564_v38 = vadd.f32 %v1494_v34, %v563_v36 }
  0x9b   : > { %vm683_vm1 = vcmp.gt.f32.partialorder %v524_v37, 0.0  ;;  %v747_v39 = vmul.f32 0.2, %v524_v37  ;;  %vm699_vm2 = vcmp.gt.f32.partialorder %v564_v38, 0.0  ;;  %v763_v40 = vmul.f32 0.2, %v564_v38 }
  0x9d   : > { %v811_v41 = vsel %vm683_vm1, %v524_v37, %v747_v39  ;;  %v827_v42 = vsel %vm699_vm2, %v564_v38, %v763_v40 }
  0x9e   : > { %875 = vst [vmem:[%s1500_s10] sm:$0xff] %v811_v41 }
  0x9f   : > { %891 = vst [vmem:[%s1500_s10 + $0x80] sm:$0xff] %v827_v42  ;;  %v603_v43 = vpop.f32.mrf.mxu2  ;;  %v643_v44 = vpop.f32.mrf.mxu3 }
  0xa0   : > { %v604_v45 = vadd.f32 %v1494_v34, %v603_v43  ;;  %v644_v46 = vadd.f32 %v1494_v34, %v643_v44  ;;  %v525_v47 = vpop.f32.mrf.mxu0  ;;  %v565_v48 = vpop.f32.mrf.mxu1 }
  0xa1   : > { %v526_v49 = vadd.f32 %v1494_v34, %v525_v47  ;;  %v566_v50 = vadd.f32 %v1494_v34, %v565_v48 }
  0xa2   : > { %vm715_vm3 = vcmp.gt.f32.partialorder %v604_v45, 0.0  ;;  %v779_v51 = vmul.f32 0.2, %v604_v45  ;;  %vm731_vm4 = vcmp.gt.f32.partialorder %v644_v46, 0.0  ;;  %v795_v52 = vmul.f32 0.2, %v644_v46 }
  0xa3   : > { %vm684_vm5 = vcmp.gt.f32.partialorder %v526_v49, 0.0  ;;  %v748_v53 = vmul.f32 0.2, %v526_v49  ;;  %vm700_vm6 = vcmp.gt.f32.partialorder %v566_v50, 0.0  ;;  %v764_v54 = vmul.f32 0.2, %v566_v50 }
  0xa4   : > { %v843_v55 = vsel %vm715_vm3, %v604_v45, %v779_v51  ;;  %v859_v56 = vsel %vm731_vm4, %v644_v46, %v795_v52 }
  0xa5   : > { %907 = vst [vmem:[%s1500_s10 + $0x100] sm:$0xff] %v843_v55  ;;  %v812_v57 = vsel %vm684_vm5, %v526_v49, %v748_v53  ;;  %v828_v58 = vsel %vm700_vm6, %v566_v50, %v764_v54 }
  0xa6   : > { %923 = vst [vmem:[%s1500_s10 + $0x180] sm:$0xff] %v859_v56 }
  0xa7   : > { %876 = vst [vmem:[%s1500_s10 + $0x8] sm:$0xff] %v812_v57  ;;  %v605_v59 = vpop.f32.mrf.mxu2  ;;  %v645_v60 = vpop.f32.mrf.mxu3 }
  0xa8   : > { %892 = vst [vmem:[%s1500_s10 + $0x88] sm:$0xff] %v828_v58  ;;  %v606_v61 = vadd.f32 %v1494_v34, %v605_v59  ;;  %v646_v62 = vadd.f32 %v1494_v34, %v645_v60  ;;  %v528_v63 = vpop.f32.mrf.mxu0  ;;  %v568_v0 = vpop.f32.mrf.mxu1 }
  0xa9   : > { %v529_v1 = vadd.f32 %v1494_v34, %v528_v63  ;;  %v569_v2 = vadd.f32 %v1494_v34, %v568_v0 }
  0xaa   : > { %vm716_vm7 = vcmp.gt.f32.partialorder %v606_v61, 0.0  ;;  %v780_v3 = vmul.f32 0.2, %v606_v61  ;;  %vm732_vm8 = vcmp.gt.f32.partialorder %v646_v62, 0.0  ;;  %v796_v4 = vmul.f32 0.2, %v646_v62 }
  0xab   : > { %vm685_vm9 = vcmp.gt.f32.partialorder %v529_v1, 0.0  ;;  %v749_v5 = vmul.f32 0.2, %v529_v1  ;;  %vm701_vm10 = vcmp.gt.f32.partialorder %v569_v2, 0.0  ;;  %v765_v6 = vmul.f32 0.2, %v569_v2 }
  0xac   : > { %v844_v7 = vsel %vm716_vm7, %v606_v61, %v780_v3  ;;  %v860_v8 = vsel %vm732_vm8, %v646_v62, %v796_v4 }
  0xad   : > { %908 = vst [vmem:[%s1500_s10 + $0x108] sm:$0xff] %v844_v7  ;;  %v813_v9 = vsel %vm685_vm9, %v529_v1, %v749_v5  ;;  %v829_v10 = vsel %vm701_vm10, %v569_v2, %v765_v6 }
  0xae   : > { %924 = vst [vmem:[%s1500_s10 + $0x188] sm:$0xff] %v860_v8 }
  0xaf   : > { %877 = vst [vmem:[%s1500_s10 + $0x10] sm:$0xff] %v813_v9  ;;  %v608_v11 = vpop.f32.mrf.mxu2  ;;  %v648_v12 = vpop.f32.mrf.mxu3 }
  0xb0   : > { %893 = vst [vmem:[%s1500_s10 + $0x90] sm:$0xff] %v829_v10  ;;  %v609_v13 = vadd.f32 %v1494_v34, %v608_v11  ;;  %v649_v14 = vadd.f32 %v1494_v34, %v648_v12  ;;  %v530_v15 = vpop.f32.mrf.mxu0  ;;  %v570_v16 = vpop.f32.mrf.mxu1 }
  0xb1   : > { %v531_v17 = vadd.f32 %v1494_v34, %v530_v15  ;;  %v571_v18 = vadd.f32 %v1494_v34, %v570_v16 }
  0xb2   : > { %vm717_vm11 = vcmp.gt.f32.partialorder %v609_v13, 0.0  ;;  %v781_v19 = vmul.f32 0.2, %v609_v13  ;;  %vm733_vm12 = vcmp.gt.f32.partialorder %v649_v14, 0.0  ;;  %v797_v20 = vmul.f32 0.2, %v649_v14 }
  0xb3   : > { %vm686_vm13 = vcmp.gt.f32.partialorder %v531_v17, 0.0  ;;  %v750_v21 = vmul.f32 0.2, %v531_v17  ;;  %vm702_vm14 = vcmp.gt.f32.partialorder %v571_v18, 0.0  ;;  %v766_v22 = vmul.f32 0.2, %v571_v18 }
  0xb4   : > { %v845_v23 = vsel %vm717_vm11, %v609_v13, %v781_v19  ;;  %v861_v24 = vsel %vm733_vm12, %v649_v14, %v797_v20 }
  0xb5   : > { %909 = vst [vmem:[%s1500_s10 + $0x110] sm:$0xff] %v845_v23  ;;  %v814_v25 = vsel %vm686_vm13, %v531_v17, %v750_v21  ;;  %v830_v26 = vsel %vm702_vm14, %v571_v18, %v766_v22 }
  0xb6   : > { %925 = vst [vmem:[%s1500_s10 + $0x190] sm:$0xff] %v861_v24 }
  0xb7   : > { %878 = vst [vmem:[%s1500_s10 + $0x18] sm:$0xff] %v814_v25  ;;  %v610_v27 = vpop.f32.mrf.mxu2  ;;  %v650_v28 = vpop.f32.mrf.mxu3 }
  0xb8   : > { %894 = vst [vmem:[%s1500_s10 + $0x98] sm:$0xff] %v830_v26  ;;  %v611_v29 = vadd.f32 %v1494_v34, %v610_v27  ;;  %v651_v30 = vadd.f32 %v1494_v34, %v650_v28  ;;  %v533_v31 = vpop.f32.mrf.mxu0  ;;  %v573_v32 = vpop.f32.mrf.mxu1 }
  0xb9   : > { %v534_v33 = vadd.f32 %v1494_v34, %v533_v31  ;;  %v574_v35 = vadd.f32 %v1494_v34, %v573_v32 }
  0xba   : > { %vm718_vm15 = vcmp.gt.f32.partialorder %v611_v29, 0.0  ;;  %v782_v36 = vmul.f32 0.2, %v611_v29  ;;  %vm734_vm0 = vcmp.gt.f32.partialorder %v651_v30, 0.0  ;;  %v798_v37 = vmul.f32 0.2, %v651_v30 }
  0xbb   : > { %vm687_vm1 = vcmp.gt.f32.partialorder %v534_v33, 0.0  ;;  %v751_v38 = vmul.f32 0.2, %v534_v33  ;;  %vm703_vm2 = vcmp.gt.f32.partialorder %v574_v35, 0.0  ;;  %v767_v39 = vmul.f32 0.2, %v574_v35 }
  0xbc   : > { %v846_v40 = vsel %vm718_vm15, %v611_v29, %v782_v36  ;;  %v862_v41 = vsel %vm734_vm0, %v651_v30, %v798_v37 }
  0xbd   : > { %910 = vst [vmem:[%s1500_s10 + $0x118] sm:$0xff] %v846_v40  ;;  %v815_v42 = vsel %vm687_vm1, %v534_v33, %v751_v38  ;;  %v831_v43 = vsel %vm703_vm2, %v574_v35, %v767_v39 }
  0xbe   : > { %926 = vst [vmem:[%s1500_s10 + $0x198] sm:$0xff] %v862_v41 }
  0xbf   : > { %879 = vst [vmem:[%s1500_s10 + $0x20] sm:$0xff] %v815_v42  ;;  %v613_v44 = vpop.f32.mrf.mxu2  ;;  %v653_v45 = vpop.f32.mrf.mxu3 }
  0xc0   : > { %895 = vst [vmem:[%s1500_s10 + $0xa0] sm:$0xff] %v831_v43  ;;  %v614_v46 = vadd.f32 %v1494_v34, %v613_v44  ;;  %v654_v47 = vadd.f32 %v1494_v34, %v653_v45  ;;  %v535_v48 = vpop.f32.mrf.mxu0  ;;  %v575_v49 = vpop.f32.mrf.mxu1 }
  0xc1   : > { %v536_v50 = vadd.f32 %v1494_v34, %v535_v48  ;;  %v576_v51 = vadd.f32 %v1494_v34, %v575_v49 }
  0xc2   : > { %vm719_vm3 = vcmp.gt.f32.partialorder %v614_v46, 0.0  ;;  %v783_v52 = vmul.f32 0.2, %v614_v46  ;;  %vm735_vm4 = vcmp.gt.f32.partialorder %v654_v47, 0.0  ;;  %v799_v53 = vmul.f32 0.2, %v654_v47 }
  0xc3   : > { %vm688_vm5 = vcmp.gt.f32.partialorder %v536_v50, 0.0  ;;  %v752_v54 = vmul.f32 0.2, %v536_v50  ;;  %vm704_vm6 = vcmp.gt.f32.partialorder %v576_v51, 0.0  ;;  %v768_v55 = vmul.f32 0.2, %v576_v51 }
  0xc4   : > { %v847_v56 = vsel %vm719_vm3, %v614_v46, %v783_v52  ;;  %v863_v57 = vsel %vm735_vm4, %v654_v47, %v799_v53 }
  0xc5   : > { %911 = vst [vmem:[%s1500_s10 + $0x120] sm:$0xff] %v847_v56  ;;  %v816_v58 = vsel %vm688_vm5, %v536_v50, %v752_v54  ;;  %v832_v59 = vsel %vm704_vm6, %v576_v51, %v768_v55 }
  0xc6   : > { %927 = vst [vmem:[%s1500_s10 + $0x1a0] sm:$0xff] %v863_v57 }
  0xc7   : > { %880 = vst [vmem:[%s1500_s10 + $0x28] sm:$0xff] %v816_v58  ;;  %v615_v60 = vpop.f32.mrf.mxu2  ;;  %v655_v61 = vpop.f32.mrf.mxu3 }
  0xc8   : > { %896 = vst [vmem:[%s1500_s10 + $0xa8] sm:$0xff] %v832_v59  ;;  %v616_v62 = vadd.f32 %v1494_v34, %v615_v60  ;;  %v656_v63 = vadd.f32 %v1494_v34, %v655_v61  ;;  %v538_v0 = vpop.f32.mrf.mxu0  ;;  %v578_v1 = vpop.f32.mrf.mxu1 }
  0xc9   : > { %v539_v2 = vadd.f32 %v1494_v34, %v538_v0  ;;  %v579_v3 = vadd.f32 %v1494_v34, %v578_v1 }
  0xca   : > { %vm720_vm7 = vcmp.gt.f32.partialorder %v616_v62, 0.0  ;;  %v784_v4 = vmul.f32 0.2, %v616_v62  ;;  %vm736_vm8 = vcmp.gt.f32.partialorder %v656_v63, 0.0  ;;  %v800_v5 = vmul.f32 0.2, %v656_v63 }
  0xcb   : > { %vm689_vm9 = vcmp.gt.f32.partialorder %v539_v2, 0.0  ;;  %v753_v6 = vmul.f32 0.2, %v539_v2  ;;  %vm705_vm10 = vcmp.gt.f32.partialorder %v579_v3, 0.0  ;;  %v769_v7 = vmul.f32 0.2, %v579_v3 }
  0xcc   : > { %v848_v8 = vsel %vm720_vm7, %v616_v62, %v784_v4  ;;  %v864_v9 = vsel %vm736_vm8, %v656_v63, %v800_v5 }
  0xcd   : > { %912 = vst [vmem:[%s1500_s10 + $0x128] sm:$0xff] %v848_v8  ;;  %v817_v10 = vsel %vm689_vm9, %v539_v2, %v753_v6  ;;  %v833_v11 = vsel %vm705_vm10, %v579_v3, %v769_v7 }
  0xce   : > { %928 = vst [vmem:[%s1500_s10 + $0x1a8] sm:$0xff] %v864_v9 }
  0xcf   : > { %881 = vst [vmem:[%s1500_s10 + $0x30] sm:$0xff] %v817_v10  ;;  %v618_v12 = vpop.f32.mrf.mxu2  ;;  %v658_v13 = vpop.f32.mrf.mxu3 }
  0xd0   : > { %897 = vst [vmem:[%s1500_s10 + $0xb0] sm:$0xff] %v833_v11  ;;  %v619_v14 = vadd.f32 %v1494_v34, %v618_v12  ;;  %v659_v15 = vadd.f32 %v1494_v34, %v658_v13  ;;  %v540_v16 = vpop.f32.mrf.mxu0  ;;  %v580_v17 = vpop.f32.mrf.mxu1 }
  0xd1   : > { %v541_v18 = vadd.f32 %v1494_v34, %v540_v16  ;;  %v581_v19 = vadd.f32 %v1494_v34, %v580_v17 }
  0xd2   : > { %vm721_vm11 = vcmp.gt.f32.partialorder %v619_v14, 0.0  ;;  %v785_v20 = vmul.f32 0.2, %v619_v14  ;;  %vm737_vm12 = vcmp.gt.f32.partialorder %v659_v15, 0.0  ;;  %v801_v21 = vmul.f32 0.2, %v659_v15 }
  0xd3   : > { %vm690_vm13 = vcmp.gt.f32.partialorder %v541_v18, 0.0  ;;  %v754_v22 = vmul.f32 0.2, %v541_v18  ;;  %vm706_vm14 = vcmp.gt.f32.partialorder %v581_v19, 0.0  ;;  %v770_v23 = vmul.f32 0.2, %v581_v19 }
  0xd4   : > { %v849_v24 = vsel %vm721_vm11, %v619_v14, %v785_v20  ;;  %v865_v25 = vsel %vm737_vm12, %v659_v15, %v801_v21 }
  0xd5   : > { %913 = vst [vmem:[%s1500_s10 + $0x130] sm:$0xff] %v849_v24  ;;  %v818_v26 = vsel %vm690_vm13, %v541_v18, %v754_v22  ;;  %v834_v27 = vsel %vm706_vm14, %v581_v19, %v770_v23 }
  0xd6   : > { %929 = vst [vmem:[%s1500_s10 + $0x1b0] sm:$0xff] %v865_v25 }
  0xd7   : > { %882 = vst [vmem:[%s1500_s10 + $0x38] sm:$0xff] %v818_v26  ;;  %v620_v28 = vpop.f32.mrf.mxu2  ;;  %v660_v29 = vpop.f32.mrf.mxu3 }
  0xd8   : > { %898 = vst [vmem:[%s1500_s10 + $0xb8] sm:$0xff] %v834_v27  ;;  %v621_v30 = vadd.f32 %v1494_v34, %v620_v28  ;;  %v661_v31 = vadd.f32 %v1494_v34, %v660_v29  ;;  %v543_v32 = vpop.f32.mrf.mxu0  ;;  %v583_v33 = vpop.f32.mrf.mxu1 }
  0xd9   : > { %v544_v35 = vadd.f32 %v1494_v34, %v543_v32  ;;  %v584_v36 = vadd.f32 %v1494_v34, %v583_v33 }
  0xda   : > { %vm722_vm15 = vcmp.gt.f32.partialorder %v621_v30, 0.0  ;;  %v786_v37 = vmul.f32 0.2, %v621_v30  ;;  %vm738_vm0 = vcmp.gt.f32.partialorder %v661_v31, 0.0  ;;  %v802_v38 = vmul.f32 0.2, %v661_v31 }
  0xdb   : > { %vm691_vm1 = vcmp.gt.f32.partialorder %v544_v35, 0.0  ;;  %v755_v39 = vmul.f32 0.2, %v544_v35  ;;  %vm707_vm2 = vcmp.gt.f32.partialorder %v584_v36, 0.0  ;;  %v771_v40 = vmul.f32 0.2, %v584_v36 }
  0xdc   : > { %v850_v41 = vsel %vm722_vm15, %v621_v30, %v786_v37  ;;  %v866_v42 = vsel %vm738_vm0, %v661_v31, %v802_v38 }
  0xdd   : > { %914 = vst [vmem:[%s1500_s10 + $0x138] sm:$0xff] %v850_v41  ;;  %v819_v43 = vsel %vm691_vm1, %v544_v35, %v755_v39  ;;  %v835_v44 = vsel %vm707_vm2, %v584_v36, %v771_v40 }
  0xde   : > { %930 = vst [vmem:[%s1500_s10 + $0x1b8] sm:$0xff] %v866_v42 }
  0xdf   : > { %883 = vst [vmem:[%s1500_s10 + $0x40] sm:$0xff] %v819_v43  ;;  %v623_v45 = vpop.f32.mrf.mxu2  ;;  %v663_v46 = vpop.f32.mrf.mxu3 }
  0xe0   : > { %899 = vst [vmem:[%s1500_s10 + $0xc0] sm:$0xff] %v835_v44  ;;  %v624_v47 = vadd.f32 %v1494_v34, %v623_v45  ;;  %v664_v48 = vadd.f32 %v1494_v34, %v663_v46  ;;  %v545_v49 = vpop.f32.mrf.mxu0  ;;  %v585_v50 = vpop.f32.mrf.mxu1 }
  0xe1   : > { %v546_v51 = vadd.f32 %v1494_v34, %v545_v49  ;;  %v586_v52 = vadd.f32 %v1494_v34, %v585_v50 }
  0xe2   : > { %vm723_vm3 = vcmp.gt.f32.partialorder %v624_v47, 0.0  ;;  %v787_v53 = vmul.f32 0.2, %v624_v47  ;;  %vm739_vm4 = vcmp.gt.f32.partialorder %v664_v48, 0.0  ;;  %v803_v54 = vmul.f32 0.2, %v664_v48 }
  0xe3   : > { %vm692_vm5 = vcmp.gt.f32.partialorder %v546_v51, 0.0  ;;  %v756_v55 = vmul.f32 0.2, %v546_v51  ;;  %vm708_vm6 = vcmp.gt.f32.partialorder %v586_v52, 0.0  ;;  %v772_v56 = vmul.f32 0.2, %v586_v52 }
  0xe4   : > { %v851_v57 = vsel %vm723_vm3, %v624_v47, %v787_v53  ;;  %v867_v58 = vsel %vm739_vm4, %v664_v48, %v803_v54 }
  0xe5   : > { %915 = vst [vmem:[%s1500_s10 + $0x140] sm:$0xff] %v851_v57  ;;  %v820_v59 = vsel %vm692_vm5, %v546_v51, %v756_v55  ;;  %v836_v60 = vsel %vm708_vm6, %v586_v52, %v772_v56 }
  0xe6   : > { %931 = vst [vmem:[%s1500_s10 + $0x1c0] sm:$0xff] %v867_v58 }
  0xe7   : > { %884 = vst [vmem:[%s1500_s10 + $0x48] sm:$0xff] %v820_v59  ;;  %v625_v61 = vpop.f32.mrf.mxu2  ;;  %v665_v62 = vpop.f32.mrf.mxu3 }
  0xe8   : > { %900 = vst [vmem:[%s1500_s10 + $0xc8] sm:$0xff] %v836_v60  ;;  %v626_v63 = vadd.f32 %v1494_v34, %v625_v61  ;;  %v666_v0 = vadd.f32 %v1494_v34, %v665_v62  ;;  %v548_v1 = vpop.f32.mrf.mxu0  ;;  %v588_v2 = vpop.f32.mrf.mxu1 }
  0xe9   : > { %v549_v3 = vadd.f32 %v1494_v34, %v548_v1  ;;  %v589_v4 = vadd.f32 %v1494_v34, %v588_v2 }
  0xea   : > { %vm724_vm7 = vcmp.gt.f32.partialorder %v626_v63, 0.0  ;;  %v788_v5 = vmul.f32 0.2, %v626_v63  ;;  %vm740_vm8 = vcmp.gt.f32.partialorder %v666_v0, 0.0  ;;  %v804_v6 = vmul.f32 0.2, %v666_v0 }
  0xeb   : > { %vm693_vm9 = vcmp.gt.f32.partialorder %v549_v3, 0.0  ;;  %v757_v7 = vmul.f32 0.2, %v549_v3  ;;  %vm709_vm10 = vcmp.gt.f32.partialorder %v589_v4, 0.0  ;;  %v773_v8 = vmul.f32 0.2, %v589_v4 }
  0xec   : > { %v852_v9 = vsel %vm724_vm7, %v626_v63, %v788_v5  ;;  %v868_v10 = vsel %vm740_vm8, %v666_v0, %v804_v6 }
  0xed   : > { %916 = vst [vmem:[%s1500_s10 + $0x148] sm:$0xff] %v852_v9  ;;  %v821_v11 = vsel %vm693_vm9, %v549_v3, %v757_v7  ;;  %v837_v12 = vsel %vm709_vm10, %v589_v4, %v773_v8 }
  0xee   : > { %932 = vst [vmem:[%s1500_s10 + $0x1c8] sm:$0xff] %v868_v10 }
  0xef   : > { %885 = vst [vmem:[%s1500_s10 + $0x50] sm:$0xff] %v821_v11  ;;  %v628_v13 = vpop.f32.mrf.mxu2  ;;  %v668_v14 = vpop.f32.mrf.mxu3 }
  0xf0   : > { %901 = vst [vmem:[%s1500_s10 + $0xd0] sm:$0xff] %v837_v12  ;;  %v629_v15 = vadd.f32 %v1494_v34, %v628_v13  ;;  %v669_v16 = vadd.f32 %v1494_v34, %v668_v14  ;;  %v550_v17 = vpop.f32.mrf.mxu0  ;;  %v590_v18 = vpop.f32.mrf.mxu1 }
  0xf1   : > { %v551_v19 = vadd.f32 %v1494_v34, %v550_v17  ;;  %v591_v20 = vadd.f32 %v1494_v34, %v590_v18 }
  0xf2   : > { %vm725_vm11 = vcmp.gt.f32.partialorder %v629_v15, 0.0  ;;  %v789_v21 = vmul.f32 0.2, %v629_v15  ;;  %vm741_vm12 = vcmp.gt.f32.partialorder %v669_v16, 0.0  ;;  %v805_v22 = vmul.f32 0.2, %v669_v16 }
  0xf3   : > { %vm694_vm13 = vcmp.gt.f32.partialorder %v551_v19, 0.0  ;;  %v758_v23 = vmul.f32 0.2, %v551_v19  ;;  %vm710_vm14 = vcmp.gt.f32.partialorder %v591_v20, 0.0  ;;  %v774_v24 = vmul.f32 0.2, %v591_v20 }
  0xf4   : > { %v853_v25 = vsel %vm725_vm11, %v629_v15, %v789_v21  ;;  %v869_v26 = vsel %vm741_vm12, %v669_v16, %v805_v22 }
  0xf5   : > { %917 = vst [vmem:[%s1500_s10 + $0x150] sm:$0xff] %v853_v25  ;;  %v822_v27 = vsel %vm694_vm13, %v551_v19, %v758_v23  ;;  %v838_v28 = vsel %vm710_vm14, %v591_v20, %v774_v24 }
  0xf6   : > { %933 = vst [vmem:[%s1500_s10 + $0x1d0] sm:$0xff] %v869_v26 }
  0xf7   : > { %886 = vst [vmem:[%s1500_s10 + $0x58] sm:$0xff] %v822_v27  ;;  %v630_v29 = vpop.f32.mrf.mxu2  ;;  %v670_v30 = vpop.f32.mrf.mxu3 }
  0xf8   : > { %902 = vst [vmem:[%s1500_s10 + $0xd8] sm:$0xff] %v838_v28  ;;  %v631_v31 = vadd.f32 %v1494_v34, %v630_v29  ;;  %v671_v32 = vadd.f32 %v1494_v34, %v670_v30  ;;  %v553_v33 = vpop.f32.mrf.mxu0  ;;  %v593_v35 = vpop.f32.mrf.mxu1 }
  0xf9   : > { %v554_v36 = vadd.f32 %v1494_v34, %v553_v33  ;;  %v594_v37 = vadd.f32 %v1494_v34, %v593_v35 }
  0xfa   : > { %vm726_vm15 = vcmp.gt.f32.partialorder %v631_v31, 0.0  ;;  %v790_v38 = vmul.f32 0.2, %v631_v31  ;;  %vm742_vm0 = vcmp.gt.f32.partialorder %v671_v32, 0.0  ;;  %v806_v39 = vmul.f32 0.2, %v671_v32 }
  0xfb   : > { %vm695_vm1 = vcmp.gt.f32.partialorder %v554_v36, 0.0  ;;  %v759_v40 = vmul.f32 0.2, %v554_v36  ;;  %vm711_vm2 = vcmp.gt.f32.partialorder %v594_v37, 0.0  ;;  %v775_v41 = vmul.f32 0.2, %v594_v37 }
  0xfc   : > { %v854_v42 = vsel %vm726_vm15, %v631_v31, %v790_v38  ;;  %v870_v43 = vsel %vm742_vm0, %v671_v32, %v806_v39 }
  0xfd   : > { %918 = vst [vmem:[%s1500_s10 + $0x158] sm:$0xff] %v854_v42  ;;  %v823_v44 = vsel %vm695_vm1, %v554_v36, %v759_v40  ;;  %v839_v45 = vsel %vm711_vm2, %v594_v37, %v775_v41 }
  0xfe   : > { %934 = vst [vmem:[%s1500_s10 + $0x1d8] sm:$0xff] %v870_v43 }
  0xff   : > { %887 = vst [vmem:[%s1500_s10 + $0x60] sm:$0xff] %v823_v44  ;;  %v633_v46 = vpop.f32.mrf.mxu2  ;;  %v673_v47 = vpop.f32.mrf.mxu3 }
 0x100   : > { %903 = vst [vmem:[%s1500_s10 + $0xe0] sm:$0xff] %v839_v45  ;;  %v634_v48 = vadd.f32 %v1494_v34, %v633_v46  ;;  %v674_v49 = vadd.f32 %v1494_v34, %v673_v47  ;;  %v555_v50 = vpop.f32.mrf.mxu0  ;;  %v595_v51 = vpop.f32.mrf.mxu1 }
 0x101   : > { %v556_v52 = vadd.f32 %v1494_v34, %v555_v50  ;;  %v596_v53 = vadd.f32 %v1494_v34, %v595_v51 }
 0x102   : > { %vm727_vm3 = vcmp.gt.f32.partialorder %v634_v48, 0.0  ;;  %v791_v54 = vmul.f32 0.2, %v634_v48  ;;  %vm743_vm4 = vcmp.gt.f32.partialorder %v674_v49, 0.0  ;;  %v807_v55 = vmul.f32 0.2, %v674_v49 }
 0x103   : > { %vm696_vm5 = vcmp.gt.f32.partialorder %v556_v52, 0.0  ;;  %v760_v56 = vmul.f32 0.2, %v556_v52  ;;  %vm712_vm6 = vcmp.gt.f32.partialorder %v596_v53, 0.0  ;;  %v776_v57 = vmul.f32 0.2, %v596_v53 }
 0x104   : > { %v855_v58 = vsel %vm727_vm3, %v634_v48, %v791_v54  ;;  %v871_v59 = vsel %vm743_vm4, %v674_v49, %v807_v55 }
 0x105   : > { %919 = vst [vmem:[%s1500_s10 + $0x160] sm:$0xff] %v855_v58  ;;  %v824_v60 = vsel %vm696_vm5, %v556_v52, %v760_v56  ;;  %v840_v61 = vsel %vm712_vm6, %v596_v53, %v776_v57 }
 0x106   : > { %935 = vst [vmem:[%s1500_s10 + $0x1e0] sm:$0xff] %v871_v59 }
 0x107   : > { %888 = vst [vmem:[%s1500_s10 + $0x68] sm:$0xff] %v824_v60  ;;  %v635_v62 = vpop.f32.mrf.mxu2  ;;  %v675_v63 = vpop.f32.mrf.mxu3 }
 0x108   : > { %904 = vst [vmem:[%s1500_s10 + $0xe8] sm:$0xff] %v840_v61  ;;  %v636_v0 = vadd.f32 %v1494_v34, %v635_v62  ;;  %v676_v1 = vadd.f32 %v1494_v34, %v675_v63  ;;  %v558_v2 = vpop.f32.mrf.mxu0  ;;  %v598_v3 = vpop.f32.mrf.mxu1 }
 0x109   : > { %v559_v4 = vadd.f32 %v1494_v34, %v558_v2  ;;  %v599_v5 = vadd.f32 %v1494_v34, %v598_v3 }
 0x10a   : > { %vm728_vm7 = vcmp.gt.f32.partialorder %v636_v0, 0.0  ;;  %v792_v6 = vmul.f32 0.2, %v636_v0  ;;  %vm744_vm8 = vcmp.gt.f32.partialorder %v676_v1, 0.0  ;;  %v808_v7 = vmul.f32 0.2, %v676_v1 }
 0x10b   : > { %vm697_vm9 = vcmp.gt.f32.partialorder %v559_v4, 0.0  ;;  %v761_v8 = vmul.f32 0.2, %v559_v4  ;;  %vm713_vm10 = vcmp.gt.f32.partialorder %v599_v5, 0.0  ;;  %v777_v9 = vmul.f32 0.2, %v599_v5 }
 0x10c   : > { %v856_v10 = vsel %vm728_vm7, %v636_v0, %v792_v6  ;;  %v872_v11 = vsel %vm744_vm8, %v676_v1, %v808_v7 }
 0x10d   : > { %920 = vst [vmem:[%s1500_s10 + $0x168] sm:$0xff] %v856_v10  ;;  %v825_v12 = vsel %vm697_vm9, %v559_v4, %v761_v8  ;;  %v841_v13 = vsel %vm713_vm10, %v599_v5, %v777_v9 }
 0x10e   : > { %936 = vst [vmem:[%s1500_s10 + $0x1e8] sm:$0xff] %v872_v11 }
 0x10f   : > { %889 = vst [vmem:[%s1500_s10 + $0x70] sm:$0xff] %v825_v12  ;;  %v638_v14 = vpop.f32.mrf.mxu2  ;;  %v678_v15 = vpop.f32.mrf.mxu3 }
 0x110   : > { %905 = vst [vmem:[%s1500_s10 + $0xf0] sm:$0xff] %v841_v13  ;;  %v639_v16 = vadd.f32 %v1494_v34, %v638_v14  ;;  %v679_v17 = vadd.f32 %v1494_v34, %v678_v15  ;;  %v560_v18 = vpop.f32.mrf.mxu0  ;;  %v600_v19 = vpop.f32.mrf.mxu1 }
 0x111   : > { %v561_v20 = vadd.f32 %v1494_v34, %v560_v18  ;;  %v601_v21 = vadd.f32 %v1494_v34, %v600_v19 }
 0x112   : > { %vm729_vm11 = vcmp.gt.f32.partialorder %v639_v16, 0.0  ;;  %v793_v22 = vmul.f32 0.2, %v639_v16  ;;  %vm745_vm12 = vcmp.gt.f32.partialorder %v679_v17, 0.0  ;;  %v809_v23 = vmul.f32 0.2, %v679_v17 }
 0x113   : > { %vm698_vm13 = vcmp.gt.f32.partialorder %v561_v20, 0.0  ;;  %v762_v24 = vmul.f32 0.2, %v561_v20  ;;  %vm714_vm14 = vcmp.gt.f32.partialorder %v601_v21, 0.0  ;;  %v778_v25 = vmul.f32 0.2, %v601_v21 }
 0x114   : > { %v857_v26 = vsel %vm729_vm11, %v639_v16, %v793_v22  ;;  %v873_v27 = vsel %vm745_vm12, %v679_v17, %v809_v23 }
 0x115   : > { %921 = vst [vmem:[%s1500_s10 + $0x170] sm:$0xff] %v857_v26  ;;  %v826_v28 = vsel %vm698_vm13, %v561_v20, %v762_v24  ;;  %v842_v29 = vsel %vm714_vm14, %v601_v21, %v778_v25 }
 0x116   : > { %937 = vst [vmem:[%s1500_s10 + $0x1f0] sm:$0xff] %v873_v27 }
 0x117   : > { %890 = vst [vmem:[%s1500_s10 + $0x78] sm:$0xff] %v826_v28  ;;  %v640_v30 = vpop.f32.mrf.mxu2  ;;  %v680_v31 = vpop.f32.mrf.mxu3 }
 0x118   : > { %906 = vst [vmem:[%s1500_s10 + $0xf8] sm:$0xff] %v842_v29  ;;  %v641_v32 = vadd.f32 %v1494_v34, %v640_v30  ;;  %v681_v33 = vadd.f32 %v1494_v34, %v680_v31 }
 0x11a   : > { %vm730_vm15 = vcmp.gt.f32.partialorder %v641_v32, 0.0  ;;  %v794_v35 = vmul.f32 0.2, %v641_v32  ;;  %vm746_vm0 = vcmp.gt.f32.partialorder %v681_v33, 0.0  ;;  %v810_v36 = vmul.f32 0.2, %v681_v33 }
 0x11c   : > { %v858_v37 = vsel %vm730_vm15, %v641_v32, %v794_v35  ;;  %v874_v38 = vsel %vm746_vm0, %v681_v33, %v810_v36 }
 0x11d   : > { %922 = vst [vmem:[%s1500_s10 + $0x178] sm:$0xff] %v858_v37 }
 0x11e   : > { %938 = vst [vmem:[%s1500_s10 + $0x1f8] sm:$0xff] %v874_v38 }
 0x11f   : > { %1307 = shalt.err (!%p1304_p3)
}
 0x120   : > { %s1344_s6 = smov 128   ;;  %s1345_s7 = smov 8  }
 0x121   : > { %1238 = dma.vmem_to_hbm [thread:$0]  (%p1404_p5), %s953_s20, 8192, %s955_s24, %s940_s25, %s1344_s6, %s1344_s6, %s1345_s7  }
 0x122 PF: > { %p1244_p4 = scmp.ge.s32.totalorder %s1342_s15, 2  ;;  %s969_s8 = sand.u32 1, %s1330_s12  }
 0x123   : > { %s970_s9 = scalar_lea.sflag [#allocation3], %s969_s8 }
 0x124   : > { %p1241_p7 = pnand %p1244_p4, %p1408_p6 }
 0x126   : > { %p1242_p8 = pneg %p1241_p7 }
 0x128   : > { %1325 = dma.done.wait (%p1242_p8), %s970_s9, 8192  }
 0x129   : > { %1327 = vsyncadd (%p1242_p8), %s970_s9, 4294959104  ;;  %p13_p9 = scmp.ge.s32.totalorder %s1391_s18, 4   ;;  %s1668_s12 = smov %s1334_s13 }
 0x12a   : > { %s1669_s13 = smov %s1338_s14  ;;  %s1670_s14 = smov %s1402_s21 }
 0x12b   : > { %s1671_s15 = smov %s1391_s18  ;;  %15 = sbr.rel (!%p13_p9) target bundleno = 3 (0x3), region = 67 }
 0x130   :  { %976 = vsyncpa [#allocation3], 1 }
 0x131   :  { %978 = vsyncpa [#allocation3 + $0x1], 1 }

</bundles_post_ra>
